<compile_context>
chip_gen: v7x
topology: tpu7x:2x2x1
jax: 0.10.0
libtpu: 0.0.40
codegen_flags: <defaults>
</compile_context>

<pallas_src>
import math
import random

import jax
import jax.numpy as jnp
from jax import lax
from jax.experimental import pallas as pl
from jax.experimental.pallas import tpu as pltpu

LANE = 128


def _bn_affine_kernel(x_ref, scale_ref, shift_ref, o_ref):
    """y = x * scale + shift.

    scale/shift are either (TR, 1) (broadcast along lanes) or (1, TL)
    (broadcast along sublanes); jnp broadcasting handles both.
    """
    o_ref[...] = (x_ref[...] * scale_ref[...] + shift_ref[...]).astype(o_ref.dtype)


def _vmem_limit_bytes():
    """Generation-aware scoped VMEM limit (explicit, never rely on defaults)."""
    cap = 64 * 1024 * 1024
    try:
        info = pltpu.get_tpu_info()
        cap = int(getattr(info, "vmem_capacity_bytes", cap))
    except Exception:
        pass
    # 3/4 of physical, but never above 64 MiB (safe on v7x's 64 MiB/TC and
    # generous on v5e/v6e's 128 MiB).
    return max(32 * 1024 * 1024, min((cap * 3) // 4, 64 * 1024 * 1024))


def _largest_aligned_divisor(dim, target, align):
    """Largest multiple of `align` that divides `dim` and is <= target, or None."""
    if dim % align != 0 or target < align:
        return None
    t = min(dim, (target // align) * align)
    while t >= align:
        if dim % t == 0:
            return t
        t -= align
    return None


def _choose_tiles(R, L, itemsize, row_align, block_budget_bytes):
    """Pick (TR, TL): full-lane blocks when possible, VMEM-bounded, aligned."""
    max_elems = max(block_budget_bytes // itemsize, row_align * LANE)

    # Lane tile: prefer the full lane extent (contiguous HBM slab per row);
    # split only if even a minimally-tall block would blow the budget.
    min_rows = min(R, row_align)
    if L <= LANE or L * min_rows <= max_elems:
        TL = L
    else:
        target = max(max_elems // min_rows, LANE)
        TL = _largest_aligned_divisor(L, target, LANE)
        if TL is None:
            # No aligned exact divisor: take an aligned tile and let the grid
            # be pl.cdiv with a padded/masked tail block (never exceed budget).
            TL = max((min(target, L) // LANE) * LANE, LANE)

    # Row tile under the remaining budget.
    max_rows = max(max_elems // max(TL, 1), 1)
    if R <= max_rows:
        TR = R  # full dim is always a legal block dim, even if unaligned
    else:
        TR = _largest_aligned_divisor(R, max_rows, row_align)
        if TR is None:
            TR = max((min(max_rows, R) // row_align) * row_align,
                     min(R, row_align))
    return TR, TL


def batchnorm_pallas(x, gamma, beta, running_mean, running_var, eps=1e-5):
    """Eval-mode BatchNorm for any (N, C, *spatial) input (1d / 2d / 3d)."""
    N, C = x.shape[0], x.shape[1]
    L = int(math.prod(x.shape[2:])) if len(x.shape) > 2 else 1

    # Fold per-channel stats + affine params into one scale/shift pair (f32).
    inv_std = lax.rsqrt(running_var.astype(jnp.float32) + jnp.float32(eps))
    scale_c = gamma.astype(jnp.float32) * inv_std                       # (C,)
    shift_c = beta.astype(jnp.float32) - running_mean.astype(jnp.float32) * scale_c

    itemsize = jnp.dtype(x.dtype).itemsize
    # 16-bit inputs: do the FMA natively (bf16 VPU on v6e/v7x); f32 stays f32.
    param_dtype = x.dtype if itemsize == 2 else jnp.float32
    # Sublane alignment follows dtype packing: f32 -> 8, bf16/f16 -> 16, 8-bit -> 32.
    row_align = {4: 8, 2: 16, 1: 32}.get(itemsize, 8)

    vmem_limit = _vmem_limit_bytes()
    block_budget = min(vmem_limit // 5, 16 * 1024 * 1024)  # 2 bufs x (in+out) + headroom

    if L % LANE == 0:
        # Lane-dense row view: (N*C, L), per-row scale/shift (row r -> channel r % C).
        R, Lv = N * C, L
        x2 = x.reshape(R, Lv)                                 # free reshape, no transpose
        scale = jnp.tile(scale_c, N).reshape(R, 1).astype(param_dtype)
        shift = jnp.tile(shift_c, N).reshape(R, 1).astype(param_dtype)
        param_block = lambda tr, tl: (tr, 1)
        param_index = lambda i, j: (i, 0)
    else:
        # Small / awkward spatial extent: keep lanes dense by flattening C into
        # the lane axis and broadcasting a (1, C*L) scale/shift lane vector.
        R, Lv = N, C * L
        x2 = x.reshape(R, Lv)
        scale = jnp.repeat(scale_c, L).reshape(1, Lv).astype(param_dtype)
        shift = jnp.repeat(shift_c, L).reshape(1, Lv).astype(param_dtype)
        param_block = lambda tr, tl: (1, tl)
        param_index = lambda i, j: (0, j)

    TR, TL = _choose_tiles(R, Lv, itemsize, row_align, block_budget)

    # v7x has 2 TensorCores sharing the "parallel" grid: if everything landed
    # in a single block, split once along an axis that stays aligned.
    if pl.cdiv(R, TR) * pl.cdiv(Lv, TL) == 1:
        alt = _largest_aligned_divisor(R, R // 2, row_align)
        if alt is not None:
            TR = alt
        else:
            alt = _largest_aligned_divisor(Lv, Lv // 2, LANE)
            if alt is not None:
                TL = alt

    grid = (pl.cdiv(R, TR), pl.cdiv(Lv, TL))

    out2 = pl.pallas_call(
        _bn_affine_kernel,
        out_shape=jax.ShapeDtypeStruct((R, Lv), x.dtype),
        grid=grid,
        in_specs=[
            pl.BlockSpec((TR, TL), lambda i, j: (i, j)),
            pl.BlockSpec(param_block(TR, TL), param_index),
            pl.BlockSpec(param_block(TR, TL), param_index),
        ],
        out_specs=pl.BlockSpec((TR, TL), lambda i, j: (i, j)),
        compiler_params=pltpu.CompilerParams(
            dimension_semantics=("parallel", "parallel"),
            vmem_limit_bytes=int(vmem_limit),
        ),
    )(x2, scale, shift)

    return out2.reshape(x.shape)


class BatchNormPallas:
    """Mirrors BatchNorm.__init__ for an NC* input.

    check() gives SPACE = [nn.BatchNorm2d] for 4-D NCHW (a single choice, so
    the random.choice draw is deterministic regardless of seed).  The module
    is freshly initialized and put in .eval(), so the forward pass uses the
    default running stats (mean=0, var=1) and affine params (gamma=1, beta=0).
    """

    def __init__(self, x, seed=0):
        random.seed(seed)
        SPACE = ["BatchNorm2d"]          # dim == 4 and LAYOUT == 'nchw'
        self.module_kind = random.choice(SPACE)
        C = x.shape[1]
        self.num_features = C
        self.eps = 1e-5
        # nn.BatchNorm2d default parameter / buffer init:
        self.gamma = jnp.ones((C,), jnp.float32)
        self.beta = jnp.zeros((C,), jnp.float32)
        self.running_mean = jnp.zeros((C,), jnp.float32)
        self.running_var = jnp.ones((C,), jnp.float32)
        # TODO(synk): training-mode batch-statistic updates (momentum) are not
        # needed here since the module is .eval(); only inference is kernelized.

    def __call__(self, x):
        return batchnorm_pallas(x, self.gamma, self.beta,
                                self.running_mean, self.running_var, self.eps)

    def reference(self, x):
        inv = 1.0 / jnp.sqrt(self.running_var + self.eps)
        shape = (1, -1) + (1,) * (x.ndim - 2)
        scale = (self.gamma * inv).reshape(shape)
        shift = (self.beta - self.running_mean * self.gamma * inv).reshape(shape)
        return x * scale + shift


if __name__ == "__main__":
    key = jax.random.PRNGKey(0)
    N, C, H, W = 2, 4, 16, 16
    x = jax.random.normal(key, (N, C, H, W), dtype=jnp.float32)

    # 1) Module-faithful config (fresh BatchNorm2d(C).eval()).
    bn = BatchNormPallas(x, seed=0)
    y = jax.block_until_ready(bn(x))
    y_ref = jax.block_until_ready(bn.reference(x))
    assert y.shape == y_ref.shape, (y.shape, y_ref.shape)
    assert jnp.allclose(y, y_ref, rtol=1e-6, atol=1e-6), \
        "Pallas BatchNorm mismatch (default stats)"

    # 2) Non-trivial per-channel stats/affine (exercises the scale/shift fold).
    k1, k2, k3, k4 = jax.random.split(jax.random.PRNGKey(1), 4)
    bn2 = BatchNormPallas(x, seed=0)
    bn2.gamma = jax.random.normal(k1, (C,), jnp.float32)
    bn2.beta = jax.random.normal(k2, (C,), jnp.float32)
    bn2.running_mean = jax.random.normal(k3, (C,), jnp.float32)
    bn2.running_var = jax.nn.softplus(jax.random.normal(k4, (C,), jnp.float32)) + 0.1
    y2 = jax.block_until_ready(bn2(x))
    y2_ref = jax.block_until_ready(bn2.reference(x))
    assert jnp.allclose(y2, y2_ref, rtol=1e-5, atol=1e-5), \
        "Pallas BatchNorm mismatch (random stats)"

    # 3) Small spatial extent (7x7 -> lane-vector path, H*W not a multiple of 128).
    xs = jax.random.normal(jax.random.PRNGKey(2), (2, 3, 7, 7), dtype=jnp.float32)
    bn3 = BatchNormPallas(xs, seed=0)
    j1, j2, j3, j4 = jax.random.split(jax.random.PRNGKey(3), 4)
    bn3.gamma = jax.random.normal(j1, (3,), jnp.float32)
    bn3.beta = jax.random.normal(j2, (3,), jnp.float32)
    bn3.running_mean = jax.random.normal(j3, (3,), jnp.float32)
    bn3.running_var = jax.nn.softplus(jax.random.normal(j4, (3,), jnp.float32)) + 0.1
    y3 = jax.block_until_ready(bn3(xs))
    y3_ref = jax.block_until_ready(bn3.reference(xs))
    assert jnp.allclose(y3, y3_ref, rtol=1e-5, atol=1e-5), \
        "Pallas BatchNorm mismatch (small spatial / lane-vector path)"

    print("KERNEL_OK")
</pallas_src>

<mosaic_0001>
module attributes {stable_mosaic.version = 11 : i64} {
  func.func @_bn_affine_kernel(%arg0: i32, %arg1: i32, %arg2: memref<8x128xf32, #tpu.memory_space<vmem>>, %arg3: memref<8x1xf32, #tpu.memory_space<vmem>>, %arg4: memref<8x1xf32, #tpu.memory_space<vmem>>, %arg5: memref<8x128xf32, #tpu.memory_space<vmem>>) attributes {dimension_semantics = [#tpu.dimension_semantics<parallel>, #tpu.dimension_semantics<parallel>], iteration_bounds = array<i64: 1, 2>, scalar_prefetch = 0 : i64, scratch_operands = 0 : i64, tpu.core_type = #tpu.core_type<tc>, window_params = [{transform_indices = @transform_0, window_bounds = array<i64: 8, 128>}, {transform_indices = @transform_1, window_bounds = array<i64: 8, 1>}, {transform_indices = @transform_2, window_bounds = array<i64: 8, 1>}, {transform_indices = @transform_3, window_bounds = array<i64: 8, 128>}]} {
    %c0 = arith.constant 0 : index
    %c0_0 = arith.constant 0 : index
    %0 = vector.load %arg2[%c0, %c0_0] : memref<8x128xf32, #tpu.memory_space<vmem>>, vector<8x128xf32>
    %c0_1 = arith.constant 0 : index
    %c0_2 = arith.constant 0 : index
    %1 = vector.load %arg3[%c0_1, %c0_2] : memref<8x1xf32, #tpu.memory_space<vmem>>, vector<8x1xf32>
    %2 = vector.broadcast %1 : vector<8x1xf32> to vector<8x128xf32>
    %3 = arith.mulf %0, %2 : vector<8x128xf32>
    %c0_3 = arith.constant 0 : index
    %c0_4 = arith.constant 0 : index
    %4 = vector.load %arg4[%c0_3, %c0_4] : memref<8x1xf32, #tpu.memory_space<vmem>>, vector<8x1xf32>
    %5 = vector.broadcast %4 : vector<8x1xf32> to vector<8x128xf32>
    %6 = arith.addf %3, %5 : vector<8x128xf32>
    %c0_5 = arith.constant 0 : index
    %c0_6 = arith.constant 0 : index
    %7 = vector.load %arg5[%c0_5, %c0_6] : memref<8x128xf32, #tpu.memory_space<vmem>>, vector<8x128xf32>
    tpu.vector_store %arg5[%c0_5, %c0_6], %6 {strides = array<i32>} : memref<8x128xf32, #tpu.memory_space<vmem>>, vector<8x128xf32>,
    return
  }
  func.func @transform_0(%arg0: i32, %arg1: i32) -> (i32, i32) {
    %c0_i32 = arith.constant 0 : i32
    return %arg0, %arg1 : i32, i32
  }
  func.func @transform_1(%arg0: i32, %arg1: i32) -> (i32, i32) {
    %c0_i32 = arith.constant 0 : i32
    %c0_i32_0 = arith.constant 0 : i32
    return %arg0, %c0_i32 : i32, i32
  }
  func.func @transform_2(%arg0: i32, %arg1: i32) -> (i32, i32) {
    %c0_i32 = arith.constant 0 : i32
    %c0_i32_0 = arith.constant 0 : i32
    return %arg0, %c0_i32 : i32, i32
  }
  func.func @transform_3(%arg0: i32, %arg1: i32) -> (i32, i32) {
    %c0_i32 = arith.constant 0 : i32
    return %arg0, %arg1 : i32, i32
  }
}

</mosaic_0001>

<bundles_post_ra>
// kernel: tpu_custom_call.1
= control target key start
LH: loop header
LB: loop body
LE: loop exit
PB: predicated region body
PF: predicated region fallthrough
CT: control target
= control target key end

     0   :  { %8 = vsyncpa [#allocation3], 0  ;;  %s655_s0 = inlined_call_operand.vmem [shape: f32[8,256], index: 0, kind: input, shape index: {}]   ;;  %s656_s1 = inlined_call_operand.vmem [shape: f32[8,1], index: 1, kind: input, shape index: {}]   ;;  %s657_s2 = inlined_call_operand.vmem [shape: f32[8,1], index: 2, kind: input, shape index: {}]   ;;  %s658_s3 = inlined_call_operand.hbm [shape: f32[8,256], index: 3, kind: output, shape index: {}]  }
   0x1   :  { %10 = vsyncpa [#allocation3 + $0x1], 0  ;;  %s537_s12 = smov 0   ;;  %s539_s13 = smov 0  }
   0x2   :  { %s541_s14 = smov 0   ;;  %s543_s15 = smov 0  }
   0x3   :  { %s545_s16 = smov 0   ;;  %s547_s17 = smov 0  }
   0x4 LB: > { %s365_s18 = sadd.s32 4294967295, %s513_s17   ;;  %s366_s19 = sadd.s32 4294967294, %s513_s17   ;;  %s513_s17 = sphi %s547_s17, %s16_s17   ;;  %s509_s16 = sphi %s545_s16, %s665_s16   ;;  %s505_s15 = sphi %s543_s15, %s664_s15   ;;  %s501_s14 = sphi %s541_s14, %s663_s14   ;;  %s497_s13 = sphi %s539_s13, %s662_s13   ;;  %s493_s12 = sphi %s537_s12, %s661_s12  }
   0x5   : > { %s25_s20 = sadd.s32 1, %s509_s16  ;;  %s117_s21 = sadd.s32 1, %s501_s14 }
   0x6   : > { %p26_p0 = scmp.ge.s32.totalorder %s25_s20, 2  ;;  %p127_p1 = scmp.ne.s32.totalorder %s501_s14, %s497_s13 }
   0x7   : > { %p128_p2 = scmp.eq.s32.totalorder %s365_s18, 1  ;;  %p133_p3 = scmp.ne.s32.totalorder %s497_s13, %s493_s12 }
   0x8   : > { %s667_s20 = smov (%p26_p0, %s25_s20), 0  ;;  %p134_p5 = scmp.eq.s32.totalorder %s366_s19, 1 }
   0x9   : > { %p577_p4 = por %p128_p2, %p127_p1  ;;  %s113_s23 = ssub.s32 %s509_s16, %s667_s20 }
   0xa   : > { %p371_p6 = scmp.ge.s32.totalorder %s513_s17, 1  ;;  %p115_p7 = scmp.eq.s32.totalorder %s113_s23, 0 }
   0xb   : > { %p584_p8 = por %p134_p5, %p133_p3  ;;  %p177_p9 = scmp.lt.s32.totalorder %s513_s17, 3 }
   0xc   : > { %s590_s25 = scalar_select %p115_p7, %s501_s14, %s117_s21  }
   0xd   : > { %p178_p10 = pnand %p371_p6, %p177_p9 }
   0xe   : > { %v229_v0 = vld [vmem:[%s656_s1] sm:$0xff] (!%p178_p10)  ;;  %v515_v1 = vmov (!%p178_p10), 0   ;;  %p214_p11 = scmp.lt.s32.totalorder (!%p178_p10), %s505_s15, 1  ;;  %s209_s4 = sand.u32 (!%p178_p10), 1, %s497_s13  }
   0xf   : > { %181 = sbr.rel (%p178_p10) target bundleno = 164 (0xa4), region = 32  ;;  %434 = vset.pattern.permute.xlu0 (!%p178_p10), %v515_v1  ;;  %v236_v2 = vld [vmem:[%s657_s2] sm:$0xff] (!%p178_p10)  ;;  %s372_s6 = sshll.u32 (!%p178_p10), %s209_s4, 3 }
  0x10   : > { %232 = vperm.xlu0 (!%p178_p10), %434, %v229_v0   ;;  %s375_s10 = sshll.u32 (!%p178_p10), %s505_s15, 7  ;;  %s211_s11 = scalar_lea.vmem (!%p178_p10), [#allocation2], %s372_s6 }
  0x11   : > { %s260_s18 = sshll.u32 (!%p178_p10), %s211_s11, 4  ;;  %s608_s23 = scalar_lea.hbm (!%p178_p10), %s658_s3, %s375_s10  ;;  %s610_s18 = int_to_ptr.vmem [resolvable:$true] %s260_s18 }
  0x12   : > { %s245_s26 = scalar_lea.sflag (!%p178_p10), [#allocation3], %s209_s4  ;;  %s435_s27 = scalar_lea.vmem (!%p178_p10), %s610_s18, 128 }
  0x13   : > { %p436_p12 = scmp.ne.s32.totalorder (!%p178_p10), %s610_s18, %s435_s27 }
  0x14   : > { %239 = vperm.xlu0 (!%p178_p10), %434, %v236_v2  }
  0x15   : > { %p437_p13 = pnand (!%p178_p10), %p436_p12, %p577_p4 }
  0x16   : > { %s215_s30 = scalar_select %p214_p11, %s505_s15, 1 }
  0x17   : > { %p438_p0 = pneg %p437_p13  ;;  %s516_s15 = smov [#allocation2]  }
  0x18   : > { %s373_s5 = sshll.u32 %s215_s30, 3  ;;  %s439_s28 = sshll.u32 %s516_s15, 4  ;;  %s440_s28 = int_to_ptr.vmem [resolvable:$false] %s439_s28 }
  0x19   : > { %s219_s9 = scalar_lea.vmem %s655_s0, %s373_s5  ;;  %s441_s29 = scalar_lea.vmem %s440_s28, 256 }
  0x1a   : > { %v228_v4 = vld [vmem:[%s219_s9] sm:$0xff]  ;;  %p442_p1 = scmp.lt.s32.totalorder %s610_s18, %s440_s28  ;;  %p443_p2 = scmp.lt.s32.totalorder %s441_s29, %s435_s27 }
  0x1c   : > { %p444_p3 = por %p443_p2, %p442_p1 }
  0x1e   : > { %p445_p5 = pnand %p444_p3, %p438_p0 }
  0x8f   : > { %v233_v3 = vpop.permute.xlu0 %232 }
  0x90   : > { %v235_v5 = vmul.f32 %v233_v3, %v228_v4 }
  0x93   : > { %v240_v6 = vpop.permute.xlu0 %239 }
  0x94   : > { %v242_v7 = vadd.f32 %v240_v6, %v235_v5 }
  0x96   : > { %243 = vst [vmem:[%s211_s11] sm:$0xff] %v242_v7 }
  0x97   : > { %448 = shalt.err (!%p445_p5)
}
  0x98   : > { %s449_s30 = scalar_lea.hbm %s608_s23, 128  ;;  %s453_s6 = scalar_lea.hbm %s658_s3, 256 }
  0x99   : > { %p450_p6 = scmp.ne.s32.totalorder %s608_s23, %s449_s30  ;;  %p454_p10 = scmp.lt.u32.totalorder %s608_s23, %s658_s3 }
  0x9a   : > { %p455_p11 = scmp.lt.u32.totalorder %s453_s6, %s449_s30  ;;  %p457_p13 = scmp.lt.u32.totalorder %s449_s30, %s608_s23 }
  0x9b   : > { %p451_p7 = pnand %p450_p6, %p577_p4 }
  0x9c   : > { %p456_p12 = por %p455_p11, %p454_p10 }
  0x9d   : > { %p452_p9 = pneg %p451_p7 }
  0x9e   : > { %p458_p0 = por %p457_p13, %p456_p12 }
  0xa0   : > { %p459_p1 = pnand %p458_p0, %p452_p9 }
  0xa2   : > { %462 = shalt.err (!%p459_p1)
}
  0xa3   : > { %378 = dma.vmem_to_hbm [thread:$0]  (%p577_p4), %s610_s18, 128, %s608_s23, %s245_s26  }
  0xa4 PF: > { %p384_p2 = scmp.ge.s32.totalorder %s513_s17, 2  ;;  %s272_s9 = sand.u32 1, %s493_s12  }
  0xa5   : > { %s273_s10 = scalar_lea.sflag [#allocation3], %s272_s9 }
  0xa6   : > { %p381_p3 = pnand %p384_p2, %p584_p8 }
  0xa8   : > { %488 = dma.done.wait (!%p381_p3), %s273_s10, 128  }
  0xa9   : > { %490 = vsyncadd (!%p381_p3), %s273_s10, 4294967168  ;;  %s16_s17 = sadd.s32 1, %s513_s17   ;;  %s661_s12 = smov %s497_s13 }
  0xaa   : > { %p13_p5 = scmp.ge.s32.totalorder %s16_s17, 4   ;;  %s662_s13 = smov %s501_s14 }
  0xab   : > { %s663_s14 = smov %s590_s25  ;;  %s664_s15 = smov %s509_s16 }
  0xac   : > { %s665_s16 = smov %s667_s20  ;;  %15 = sbr.rel (!%p13_p5) target bundleno = 4 (0x4), region = 73 }
  0xb3   :  { %278 = vsyncpa [#allocation3], 1 }
  0xb4   :  { %280 = vsyncpa [#allocation3 + $0x1], 1 }

</bundles_post_ra>
